<compile_context>
chip_gen: v5e
topology: v5e:2x2
jax: 0.10.0
libtpu: 0.0.40
codegen_flags: <defaults>
</compile_context>

<pallas_src>
import jax
import jax.numpy as jnp
from jax import lax
from jax.experimental import pallas as pl
from jax.experimental.pallas import tpu as pltpu


def _bahdanau_kernel(q_ref, pk_ref, val_ref, wqt_ref, wv_ref, ctx_ref, alpha_ref):
    # Blocks: q [TB,H], pk/val [TB,S,H] (f32 or bf16), wqt [H,H] (=Wq^T), wv [1,H].
    q = q_ref[...].astype(jnp.float32)
    wqt = wqt_ref[...].astype(jnp.float32)
    wv = wv_ref[...].astype(jnp.float32)

    # query_layer(query): q @ Wq^T -> [TB,H].  One real MXU matmul; HIGHEST
    # keeps it f32-accurate so the kernel matches an f32 reference.
    qproj = jnp.dot(q, wqt, precision=lax.Precision.HIGHEST,
                    preferred_element_type=jnp.float32)

    # tanh(qproj + proj_key), broadcast over S -> [TB,S,H].  bf16 proj_key is
    # promoted inside the add (no materialized whole-slab f32 copy); tanh: EUP.
    e = jnp.tanh(qproj[:, None, :] + pk_ref[...])

    # value_layer(e): scores[b,s] = sum_h e*wv.  VPU multiply + lane (H) reduce
    # (an MXU dot with N=1 would waste the MXU and its result FIFO).
    scores = jnp.sum(e * wv, axis=-1)                          # [TB, S]

    # NOTE: mask is intentionally a no-op (reference discards the out-of-place
    # masked_fill result).  Numerically stable softmax; the denominator is only
    # [TB,1], so an exact reciprocal/divide costs nothing.
    m = jnp.max(scores, axis=-1, keepdims=True)
    p = jnp.exp(scores - m)
    alphas = p * (1.0 / jnp.sum(p, axis=-1, keepdims=True))    # [TB, S]

    # context = bmm(alphas, value) -> [TB,H].  VPU multiply + sublane (S)
    # reduce instead of TB degenerate M=1 matmuls; bf16 value promotes in-op.
    ctx = jnp.sum(alphas[:, :, None] * val_ref[...], axis=1)

    ctx_ref[...] = ctx.astype(ctx_ref.dtype)
    alpha_ref[...] = alphas.astype(alpha_ref.dtype)


def _vmem_limit_bytes():
    """Scoped-VMEM request: ~3/4 of physical VMEM, capped at 96 MiB.
    (v5e/v6e: 128 MiB physical -> 96 MiB; v7x: 64 MiB per TensorCore -> 48 MiB.)"""
    cap = 64 * 1024 * 1024
    try:
        cap = int(getattr(pltpu.get_tpu_info(), "vmem_capacity_bytes", cap))
    except Exception:
        pass
    return int(min(cap * 3 // 4, 96 * 1024 * 1024))


def _choose_batch_tile(B, S, H, pk_itemsize, val_itemsize, vmem_limit):
    """Batch rows per grid step.

    Counts the double-buffered pk/val streams AND the f32 intermediates (tanh
    slab, score product, alphas*value product) against half the scoped VMEM
    limit; clamps so the block never exceeds B (no wrapper-side padding) and,
    for B>=16, so there are >=2 grid steps (megacore sharding on v7x)."""
    if B <= 8:
        return int(B)            # one block; every block dim equals the array dim
    per_row = (2 * S * H * (pk_itemsize + val_itemsize)   # 2 pipeline buffers each
               + 12 * S * H                               # ~3 f32 [S,H] temporaries
               + 8 * (H + S))                             # outputs, double-buffered
    budget = vmem_limit // 2                              # headroom for weights/misc
    tb = max(8, (budget // max(per_row, 1)) // 8 * 8)
    if B >= 16:
        tb = min(tb, (-(-B // 2) + 7) // 8 * 8)           # guarantee >=2 grid steps
    tb = min(tb, (B // 8) * 8)                            # block never exceeds array
    return int(tb)


def bahdanau_attention(query, proj_key, value, mask, wq, wv):
    """query [B,1,H], proj_key/value [B,S,H] (f32 or bf16), mask [B,>=S],
    wq [H,H] (query_layer.weight), wv [1,H] (value_layer.weight).
    Returns (context [B,1,H], alphas [B,1,S]).

    Callers may stream proj_key/value as bf16 to halve HBM traffic (biggest
    win on v5e); the kernel keeps all math in f32 via in-op promotion.
    WARNING: mask is a deliberate no-op, matching the reference module's
    discarded masked_fill result."""
    B, _, H = query.shape
    S = proj_key.shape[1]
    del mask   # sliced to [:, :S] by the reference, then its effect is discarded

    q2 = query.reshape(B, H)      # lane-dense [B,H] presentation
    wq_t = wq.T                   # [H_in,H_out] so the kernel does a plain q @ wq_t

    vmem_limit = _vmem_limit_bytes()
    TB = _choose_batch_tile(B, S, H,
                            jnp.dtype(proj_key.dtype).itemsize,
                            jnp.dtype(value.dtype).itemsize,
                            vmem_limit)
    grid = (pl.cdiv(B, TB),)

    ctx2, alphas2 = pl.pallas_call(
        _bahdanau_kernel,
        out_shape=(jax.ShapeDtypeStruct((B, H), query.dtype),
                   jax.ShapeDtypeStruct((B, S), query.dtype)),
        grid_spec=pltpu.PrefetchScalarGridSpec(
            num_scalar_prefetch=0,
            grid=grid,
            in_specs=[
                pl.BlockSpec((TB, H), lambda b: (b, 0)),        # query (flat)
                pl.BlockSpec((TB, S, H), lambda b: (b, 0, 0)),  # proj_key stream
                pl.BlockSpec((TB, S, H), lambda b: (b, 0, 0)),  # value stream
                pl.BlockSpec((H, H), lambda b: (0, 0)),         # Wq^T (resident)
                pl.BlockSpec((1, H), lambda b: (0, 0)),         # Wv   (resident)
            ],
            out_specs=[
                pl.BlockSpec((TB, H), lambda b: (b, 0)),        # context slab
                pl.BlockSpec((TB, S), lambda b: (b, 0)),        # alphas slab
            ],
        ),
        compiler_params=pltpu.CompilerParams(
            dimension_semantics=("parallel",),
            vmem_limit_bytes=vmem_limit),
    )(q2, proj_key, value, wq_t, wv)

    # Restore the module's [B,1,H] / [B,1,S] interface.
    return ctx2.reshape(B, 1, H), alphas2.reshape(B, 1, S)


def _reference(query, proj_key, value, mask, wq, wv):
    hi = lax.Precision.HIGHEST    # keep the reference f32-accurate on TPU too
    qproj = jnp.einsum("bqh,oh->bqo", query, wq, precision=hi)
    scores = jnp.einsum("bsh,oh->bso", jnp.tanh(qproj + proj_key), wv, precision=hi)
    scores = jnp.transpose(scores, (0, 2, 1))                  # [B,1,S]
    # mask intentionally unused (reference bug: masked_fill result discarded)
    alphas = jax.nn.softmax(scores, axis=-1)
    context = jnp.einsum("bqs,bsh->bqh", alphas, value, precision=hi)
    return context, alphas


def _run_case(B, S, H, stream_dtype, seed):
    key = jax.random.PRNGKey(seed)
    k_q, k_pk, k_v, k_wq, k_wv = jax.random.split(key, 5)
    query = jax.random.normal(k_q, (B, 1, H), dtype=jnp.float32)
    proj_key = jax.random.normal(k_pk, (B, S, H), dtype=jnp.float32).astype(stream_dtype)
    value = jax.random.normal(k_v, (B, S, H), dtype=jnp.float32).astype(stream_dtype)
    mask = jnp.ones((B, S), dtype=jnp.int32)

    # Deterministic parameter init (shapes from BahdanauAttention.__init__).
    bound = float(H) ** -0.5
    wq = jax.random.uniform(k_wq, (H, H), jnp.float32, -bound, bound)   # query_layer.weight
    wv = jax.random.uniform(k_wv, (1, H), jnp.float32, -bound, bound)   # value_layer.weight

    ctx, alphas = bahdanau_attention(query, proj_key, value, mask, wq, wv)
    jax.block_until_ready((ctx, alphas))

    ctx_ref, alphas_ref = _reference(query, proj_key, value, mask, wq, wv)
    assert ctx.shape == (B, 1, H) and alphas.shape == (B, 1, S)
    # Both sides do f32 math on identical inputs (HIGHEST matmuls, exact softmax
    # divide), so they agree to ~1e-6; 1e-3 leaves headroom for EUP tanh/exp
    # implementation differences between Mosaic and XLA.
    assert jnp.allclose(ctx, alphas_ref * 0 + ctx_ref, atol=1e-3, rtol=1e-3) \
        if False else jnp.allclose(ctx, ctx_ref, atol=1e-3, rtol=1e-3), \
        ("context max|diff|", float(jnp.max(jnp.abs(ctx - ctx_ref))))
    assert jnp.allclose(alphas, alphas_ref, atol=1e-3, rtol=1e-3), \
        ("alphas max|diff|", float(jnp.max(jnp.abs(alphas - alphas_ref))))


if __name__ == "__main__":
    # Module-sized smoke test (batch=2, seq=8, hidden=32), f32 streams.
    _run_case(B=2, S=8, H=32, stream_dtype=jnp.float32, seed=0)
    # Multi-step grid with a ragged last block (B=12 -> TB=8, 2 grid steps, no
    # wrapper-side padding) and bf16-streamed proj_key/value (caller contract).
    _run_case(B=12, S=8, H=32, stream_dtype=jnp.bfloat16, seed=1)
    print("KERNEL_OK")
</pallas_src>

<mosaic_0001>
module attributes {stable_mosaic.version = 11 : i64} {
  func.func @_bahdanau_kernel(%arg0: i32, %arg1: memref<2x32xf32, #tpu.memory_space<vmem>>, %arg2: memref<2x8x32xf32, #tpu.memory_space<vmem>>, %arg3: memref<2x8x32xf32, #tpu.memory_space<vmem>>, %arg4: memref<32x32xf32, #tpu.memory_space<vmem>>, %arg5: memref<1x32xf32, #tpu.memory_space<vmem>>, %arg6: memref<2x32xf32, #tpu.memory_space<vmem>>, %arg7: memref<2x8xf32, #tpu.memory_space<vmem>>) attributes {dimension_semantics = [#tpu.dimension_semantics<parallel>], iteration_bounds = array<i64: 1>, scalar_prefetch = 0 : i64, scratch_operands = 0 : i64, tpu.core_type = #tpu.core_type<tc>, window_params = [{transform_indices = @transform_0, window_bounds = array<i64: 2, 32>}, {transform_indices = @transform_1, window_bounds = array<i64: 2, 8, 32>}, {transform_indices = @transform_2, window_bounds = array<i64: 2, 8, 32>}, {pipeline_mode = #tpu.pipeline_mode<synchronous>, transform_indices = @transform_3, window_bounds = array<i64: 32, 32>}, {pipeline_mode = #tpu.pipeline_mode<synchronous>, transform_indices = @transform_4, window_bounds = array<i64: 1, 32>}, {transform_indices = @transform_5, window_bounds = array<i64: 2, 32>}, {transform_indices = @transform_6, window_bounds = array<i64: 2, 8>}]} {
    %c0 = arith.constant 0 : index
    %c0_0 = arith.constant 0 : index
    %0 = vector.load %arg1[%c0, %c0_0] : memref<2x32xf32, #tpu.memory_space<vmem>>, vector<2x32xf32>
    %c0_1 = arith.constant 0 : index
    %c0_2 = arith.constant 0 : index
    %1 = vector.load %arg4[%c0_1, %c0_2] : memref<32x32xf32, #tpu.memory_space<vmem>>, vector<32x32xf32>
    %c0_3 = arith.constant 0 : index
    %c0_4 = arith.constant 0 : index
    %2 = vector.load %arg5[%c0_3, %c0_4] : memref<1x32xf32, #tpu.memory_space<vmem>>, vector<1x32xf32>
    %cst = arith.constant dense<0.000000e+00> : vector<2x32xf32>
    %3 = tpu.matmul %0, %1, %cst {dimension_numbers = #tpu.dot_dimension_numbers<[1], [0], [0], [1], [0, 0, 1, 1], [], []>, precision = #tpu.contract_precision<fp32>} : vector<2x32xf32>, vector<32x32xf32>, vector<2x32xf32> -> vector<2x32xf32>
    %4 = vector.shape_cast %3 : vector<2x32xf32> to vector<2x1x32xf32>
    %c0_5 = arith.constant 0 : index
    %c0_6 = arith.constant 0 : index
    %c0_7 = arith.constant 0 : index
    %5 = vector.load %arg2[%c0_5, %c0_6, %c0_7] : memref<2x8x32xf32, #tpu.memory_space<vmem>>, vector<2x8x32xf32>
    %6 = vector.broadcast %4 : vector<2x1x32xf32> to vector<2x8x32xf32>
    %7 = arith.addf %6, %5 : vector<2x8x32xf32>
    %8 = math.tanh %7 : vector<2x8x32xf32>
    %9 = vector.shape_cast %2 : vector<1x32xf32> to vector<1x1x32xf32>
    %10 = vector.broadcast %9 : vector<1x1x32xf32> to vector<2x8x32xf32>
    %11 = arith.mulf %8, %10 : vector<2x8x32xf32>
    %cst_8 = arith.constant dense<0.000000e+00> : vector<2x8xf32>
    %12 = vector.multi_reduction <add>, %11, %cst_8 [2] : vector<2x8x32xf32> to vector<2x8xf32>
    %cst_9 = arith.constant dense<0xFF800000> : vector<2xf32>
    %13 = vector.multi_reduction <maximumf>, %12, %cst_9 [1] : vector<2x8xf32> to vector<2xf32>
    %14 = vector.shape_cast %13 : vector<2xf32> to vector<2x1xf32>
    %15 = vector.broadcast %14 : vector<2x1xf32> to vector<2x8xf32>
    %16 = arith.subf %12, %15 : vector<2x8xf32>
    %17 = math.exp %16 : vector<2x8xf32>
    %cst_10 = arith.constant dense<0.000000e+00> : vector<2xf32>
    %18 = vector.multi_reduction <add>, %17, %cst_10 [1] : vector<2x8xf32> to vector<2xf32>
    %19 = vector.shape_cast %18 : vector<2xf32> to vector<2x1xf32>
    %cst_11 = arith.constant 1.000000e+00 : f32
    %20 = vector.broadcast %cst_11 : f32 to vector<2x1xf32>
    %21 = arith.divf %20, %19 : vector<2x1xf32>
    %22 = vector.broadcast %21 : vector<2x1xf32> to vector<2x8xf32>
    %23 = arith.mulf %17, %22 : vector<2x8xf32>
    %24 = vector.shape_cast %23 : vector<2x8xf32> to vector<2x8x1xf32>
    %c0_12 = arith.constant 0 : index
    %c0_13 = arith.constant 0 : index
    %c0_14 = arith.constant 0 : index
    %25 = vector.load %arg3[%c0_12, %c0_13, %c0_14] : memref<2x8x32xf32, #tpu.memory_space<vmem>>, vector<2x8x32xf32>
    %26 = vector.broadcast %24 : vector<2x8x1xf32> to vector<2x8x32xf32>
    %27 = arith.mulf %26, %25 : vector<2x8x32xf32>
    %cst_15 = arith.constant dense<0.000000e+00> : vector<2x32xf32>
    %28 = vector.multi_reduction <add>, %27, %cst_15 [1] : vector<2x8x32xf32> to vector<2x32xf32>
    %c0_16 = arith.constant 0 : index
    %c0_17 = arith.constant 0 : index
    %29 = vector.load %arg6[%c0_16, %c0_17] : memref<2x32xf32, #tpu.memory_space<vmem>>, vector<2x32xf32>
    tpu.vector_store %arg6[%c0_16, %c0_17], %28 {strides = array<i32>} : memref<2x32xf32, #tpu.memory_space<vmem>>, vector<2x32xf32>,
    %c0_18 = arith.constant 0 : index
    %c0_19 = arith.constant 0 : index
    %30 = vector.load %arg7[%c0_18, %c0_19] : memref<2x8xf32, #tpu.memory_space<vmem>>, vector<2x8xf32>
    tpu.vector_store %arg7[%c0_18, %c0_19], %23 {strides = array<i32>} : memref<2x8xf32, #tpu.memory_space<vmem>>, vector<2x8xf32>,
    return
  }
  func.func @transform_0(%arg0: i32) -> (i32, i32) {
    %c0_i32 = arith.constant 0 : i32
    %c0_i32_0 = arith.constant 0 : i32
    return %arg0, %c0_i32 : i32, i32
  }
  func.func @transform_1(%arg0: i32) -> (i32, i32, i32) {
    %c0_i32 = arith.constant 0 : i32
    %c0_i32_0 = arith.constant 0 : i32
    %c0_i32_1 = arith.constant 0 : i32
    return %arg0, %c0_i32, %c0_i32_0 : i32, i32, i32
  }
  func.func @transform_2(%arg0: i32) -> (i32, i32, i32) {
    %c0_i32 = arith.constant 0 : i32
    %c0_i32_0 = arith.constant 0 : i32
    %c0_i32_1 = arith.constant 0 : i32
    return %arg0, %c0_i32, %c0_i32_0 : i32, i32, i32
  }
  func.func @transform_3(%arg0: i32) -> (i32, i32) {
    %c0_i32 = arith.constant 0 : i32
    %c0_i32_0 = arith.constant 0 : i32
    %c0_i32_1 = arith.constant 0 : i32
    return %c0_i32, %c0_i32_0 : i32, i32
  }
  func.func @transform_4(%arg0: i32) -> (i32, i32) {
    %c0_i32 = arith.constant 0 : i32
    %c0_i32_0 = arith.constant 0 : i32
    %c0_i32_1 = arith.constant 0 : i32
    return %c0_i32, %c0_i32_0 : i32, i32
  }
  func.func @transform_5(%arg0: i32) -> (i32, i32) {
    %c0_i32 = arith.constant 0 : i32
    %c0_i32_0 = arith.constant 0 : i32
    return %arg0, %c0_i32 : i32, i32
  }
  func.func @transform_6(%arg0: i32) -> (i32, i32) {
    %c0_i32 = arith.constant 0 : i32
    %c0_i32_0 = arith.constant 0 : i32
    return %arg0, %c0_i32 : i32, i32
  }
}

</mosaic_0001>

<bundles_post_ra>
// kernel: tpu_custom_call.1
= control target key start
LH: loop header
LB: loop body
LE: loop exit
PB: predicated region body
PF: predicated region fallthrough
CT: control target
= control target key end

     0   :  { %12 = vsyncpa [#allocation3], 0  ;;  %s700_s0 = inlined_call_operand.hbm [shape: f32[2,32], index: 0, kind: input, shape index: {}]   ;;  %s701_s1 = inlined_call_operand.hbm [shape: f32[2,8,32], index: 1, kind: input, shape index: {}]   ;;  %s702_s2 = inlined_call_operand.hbm [shape: f32[2,8,32], index: 2, kind: input, shape index: {}]   ;;  %s703_s3 = inlined_call_operand.hbm [shape: f32[32,32], index: 3, kind: input, shape index: {}]   ;;  %s704_s4 = inlined_call_operand.vmem [shape: f32[1,32], index: 4, kind: input, shape index: {}]   ;;  %s705_s5 = inlined_call_operand.hbm [shape: f32[2,32], index: 5, kind: output, shape index: {0}]   ;;  %s706_s6 = inlined_call_operand.hbm [shape: f32[2,8], index: 6, kind: output, shape index: {1}]  }
   0x1   :  { %13 = vsyncpa [#allocation6], 0 }
   0x2   :  { %14 = vsyncpa [#allocation9], 0 }
   0x3   :  { %15 = vsyncpa [#allocation4], 0  ;;  %s32_s23 = sshll.u32 %s701_s1, 4  ;;  %s33_s23 = int_to_ptr.hbm [resolvable:$true] %s32_s23 }
   0x4   :  { %16 = vsyncpa [#allocation12], 0  ;;  %s615_s24 = smov [#allocation5]   ;;  %s22_s28 = sshll.u32 %s700_s0, 4  ;;  %s23_s28 = int_to_ptr.hbm [resolvable:$true] %s22_s28 }
   0x5   :  { %s34_s25 = sshll.u32 %s615_s24, 4  ;;  %s616_s29 = smov 128   ;;  %s35_s25 = int_to_ptr.vmem [resolvable:$true] %s34_s25 }
   0x6   :  { %s617_s30 = smov 8   ;;  %s618_s7 = smov [#allocation2]  }
   0x7   :  { %40 = dma.hbm_to_vmem [thread:$0]  %s33_s23, 256, %s35_s25, [#allocation6], %s616_s29, %s616_s29, %s617_s30  }
   0x8   :  { %s24_s8 = sshll.u32 %s618_s7, 4  ;;  %s45_s11 = sshll.u32 %s702_s2, 4  ;;  %s25_s8 = int_to_ptr.vmem [resolvable:$true] %s24_s8  ;;  %s46_s11 = int_to_ptr.hbm [resolvable:$true] %s45_s11 }
   0x9   :  { %27 = dma.hbm_to_vmem [thread:$0]  %s23_s28, 32, %s25_s8, [#allocation3]  }
   0xa   :  { %s58_s13 = sshll.u32 %s703_s3, 4  ;;  %s619_s14 = smov [#allocation7]   ;;  %s59_s13 = int_to_ptr.hbm [resolvable:$true] %s58_s13 }
   0xb   :  { %s47_s15 = sshll.u32 %s619_s14, 4  ;;  %s620_s0 = smov [#allocation8]   ;;  %s48_s15 = int_to_ptr.vmem [resolvable:$true] %s47_s15 }
   0xc   :  { %53 = dma.hbm_to_vmem [thread:$0]  %s46_s11, 256, %s48_s15, [#allocation6], %s616_s29, %s616_s29, %s617_s30  }
   0xd   :  { %s60_s16 = sshll.u32 %s620_s0, 4  ;;  %s61_s16 = int_to_ptr.vmem [resolvable:$true] %s60_s16 }
   0xe   :  { %66 = dma.hbm_to_vmem [thread:$0]  %s59_s13, 512, %s61_s16, [#allocation9], %s616_s29, %s616_s29, %s617_s30  }
   0xf   :  { %605 = dma.done.wait [#allocation3], 32  }
  0x10   :  { %606 = vsyncadd [#allocation3], 4294967264 }
  0x11   :  { %607 = dma.done.wait [#allocation6], 512  }
  0x12   :  { %608 = vsyncadd [#allocation6], 4294966784 }
  0x13   :  { %609 = dma.done.wait [#allocation9], 512  }
  0x14   :  { %610 = vsyncadd [#allocation9], 4294966784  ;;  %vm91_vm0 = vcmask 261120   ;;  %v89_v0 = vld [vmem:[#allocation8 + $0x18] sm:$0xff]  ;;  %v88_v1 = vld [vmem:[#allocation8 + $0x10] sm:$0xff]  ;;  %v305_v57 = vlaneseq  ;;  %vm309_vm1 = vcmask 1041409  }
  0x15   :  { %v87_v2 = vld [vmem:[#allocation8 + $0x8] sm:$0xff]  ;;  %v107_v3 = vand.u32 4294901760, %v89_v0  ;;  %v109_v4 = vand.u32 4294901760, %v88_v1  ;;  %v86_v6 = vld [vmem:[#allocation8] sm:$0xff]  ;;  %v85_v7 = vld [vmem:[#allocation2] sm:$0x3] }
  0x16   :  { %v111_v5 = vand.u32 4294901760, %v87_v2  ;;  %v113_v8 = vand.u32 4294901760, %v86_v6  ;;  %v93_v9 = vsel %vm91_vm0, %v85_v7, 0  ;;  %v282_v42 = vld [vmem:[#allocation5] sm:$0xff]  ;;  %v283_v45 = vld [vmem:[#allocation5 + $0x8] sm:$0xff]  ;;  %v677_v58 = vand.u32 127, %v305_v57 }
  0x17   :  { %v137_v10 = vsub.f32 %v89_v0, %v107_v3  ;;  %108 = vmatpush.msra.mxu0 %v107_v3  ;;  %v143_v11 = vsub.f32 %v88_v1, %v109_v4  ;;  %208 = vmatpush.msra.mxu3 %v107_v3  ;;  %v115_v13 = vand.u32 4294901760, %v93_v9  ;;  %v450_v49 = vld [vmem:[%s704_s4] ss:$0 sm:$0xff]  ;;  %vm312_vm2 = vcmask 58368   ;;  %s622_s4 = smov [#allocation11]   ;;  %s421_s20 = sshll.u32 %s706_s6, 4  ;;  %s422_s20 = int_to_ptr.hbm [resolvable:$true] %s421_s20 }
  0x18   :  { %v149_v12 = vsub.f32 %v87_v2, %v111_v5  ;;  %v155_v14 = vsub.f32 %v86_v6, %v113_v8  ;;  %v621_v0 = vmov 0   ;;  %s419_s17 = sshll.u32 %s622_s4, 4  ;;  %s623_s6 = smov [#allocation10]   ;;  %vm396_vm7 = vcmask 254976   ;;  %s420_s17 = int_to_ptr.vmem [resolvable:$true] %s419_s17 }
  0x19   :  { %179 = vmatpush.msra.mxu2 %v137_v10  ;;  %110 = vmatpush.msra.mxu0 %v109_v4  ;;  %v138_v15 = vand.u32 4294901760, %v137_v10  ;;  %v144_v16 = vand.u32 4294901760, %v143_v11  ;;  %v116_v17 = vsub.f32 %v93_v9, %v115_v13  ;;  %s408_s21 = sshll.u32 %s623_s6, 4  ;;  %s410_s24 = sshll.u32 %s705_s5, 4  ;;  %s409_s21 = int_to_ptr.vmem [resolvable:$true] %s408_s21  ;;  %s411_s24 = int_to_ptr.hbm [resolvable:$true] %s410_s24 }
  0x1a   :  { %v150_v18 = vand.u32 4294901760, %v149_v12  ;;  %210 = vmatpush.msra.mxu3 %v109_v4  ;;  %v156_v19 = vand.u32 4294901760, %v155_v14  ;;  %448 = vset.pattern.permute.xlu2 %v621_v0 }
  0x1b   :  { %182 = vmatpush.msra.mxu2 %v143_v11  ;;  %v139_v20 = vsub.f32 %v137_v10, %v138_v15  ;;  %112 = vmatpush.msra.mxu0 %v111_v5  ;;  %v145_v21 = vsub.f32 %v143_v11, %v144_v16  ;;  %v117_v23 = vand.u32 4294901760, %v116_v17 }
  0x1c   :  { %v151_v22 = vsub.f32 %v149_v12, %v150_v18  ;;  %212 = vmatpush.msra.mxu3 %v111_v5  ;;  %v157_v27 = vsub.f32 %v155_v14, %v156_v19  ;;  %447 = vset.pattern.permute.xlu1 %v621_v0 }
  0x1d   :  { %v140_v24 = vand.u32 4294901760, %v139_v20  ;;  %185 = vmatpush.msra.mxu2 %v149_v12  ;;  %v146_v25 = vand.u32 4294901760, %v145_v21  ;;  %114 = vmatpush.msra.mxu0 %v113_v8  ;;  %v118_v26 = vsub.f32 %v116_v17, %v117_v23 }
  0x1e   :  { %214 = vmatpush.msra.mxu3 %v113_v8  ;;  %v152_v28 = vand.u32 4294901760, %v151_v22  ;;  %v158_v30 = vand.u32 4294901760, %v157_v27  ;;  %449 = vset.pattern.permute.xlu0 %v621_v0 }
  0x1f   :  { %237 = vmatpush.msrb.mxu0 %v138_v15  ;;  %141 = vmatpush.msra.mxu1 %v140_v24  ;;  %v119_v29 = vand.u32 4294901760, %v118_v26 }
  0x20   :  { %188 = vmatpush.msra.mxu2 %v155_v14  ;;  %218 = vmatmul.f32.vlgmr.msra.gmra.mxu3 %v117_v23 }
  0x21   :  { %191 = vmatmul.f32.vlgmr.msra.gmra.mxu2 %v116_v17  ;;  %147 = vmatpush.msra.mxu1 %v146_v25 }
  0x22   :  { %120 = vmatmul.f32.vlgmr.msra.gmra.mxu0 %v119_v29 }
  0x23   :  { %241 = vmatpush.msrb.mxu0 %v144_v16  ;;  %153 = vmatpush.msra.mxu1 %v152_v28 }
  0x25   :  { %245 = vmatpush.msrb.mxu0 %v150_v18  ;;  %159 = vmatpush.msra.mxu1 %v158_v30 }
  0x26   :  { %161 = vmatmul.f32.vlgmr.msra.gmra.mxu1 %v115_v13 }
  0x27   :  { %249 = vmatpush.msrb.mxu0 %v156_v19  ;;  %268 = vmatpush.msrb.mxu1 %v107_v3 }
  0x29   :  { %270 = vmatpush.msrb.mxu1 %v109_v4 }
  0x2a   :  { %251 = vmatmul.f32.vlgmr.msrb.gmra.mxu0 %v115_v13 }
  0x2b   :  { %272 = vmatpush.msrb.mxu1 %v111_v5 }
  0x2d   :  { %274 = vmatpush.msrb.mxu1 %v113_v8 }
  0x2e   :  { %276 = vmatmul.f32.vlgmr.msrb.gmra.mxu1 %v115_v13 }
  0x9f   :  { %v121_v31 = vpop.f32.mrf.mxu0 }
  0xa3   :  { %v162_v32 = vpop.f32.mrf.mxu1  ;;  %v219_v35 = vpop.f32.mrf.mxu3 }
  0xa4   :  { %v192_v33 = vpop.f32.mrf.mxu2  ;;  %v163_v34 = vadd.f32 %v162_v32, %v121_v31  ;;  %v365_v31 = vld [vmem:[#allocation7 + $0x8] sm:$0xff]  ;;  %v364_v32 = vld [vmem:[#allocation7] sm:$0xff] }
  0xa6   :  { %v193_v36 = vadd.f32 %v192_v33, %v163_v34 }
  0xa7   :  { %v252_v37 = vpop.f32.mrf.mxu0 }
  0xa8   :  { %v220_v38 = vadd.f32 %v219_v35, %v193_v36 }
  0xaa   :  { %v253_v39 = vadd.f32 %v252_v37, %v220_v38 }
  0xab   :  { %v277_v40 = vpop.f32.mrf.mxu1 }
  0xac   :  { %v278_v41 = vadd.f32 %v277_v40, %v253_v39 }
  0xae   :  { %v281_v43 = vrot.slane %v278_v41, 1  ;;  %v284_v44 = vperm.slane %v278_v41, 0 }
  0xb0   :  { %v285_v46 = vperm.slane %v281_v43, 0  ;;  %v288_v47 = vadd.f32 %v284_v44, %v282_v42 }
  0xb2   :  { %v289_v48 = vadd.f32 %v285_v46, %v283_v45  ;;  %451 = vtanh.f32 %v288_v47 }
  0xb4   :  { %453 = vtanh.f32 %v289_v48 }
  0xb8   :  { %v452_v50 = vpop.eup %451 }
  0xb9   :  { %v295_v51 = vmul.f32 %v452_v50, %v450_v49 }
  0xba   :  { %v454_v53 = vpop.eup %453 }
  0xbb   :  { %v297_v52 = vsel %vm91_vm0, %v295_v51, 0.0  ;;  %v296_v54 = vmul.f32 %v454_v53, %v450_v49 }
  0xbc   :  { %298 = vadd.xlane.f32.xlu0 %v297_v52 }
  0xbd   :  { %v300_v55 = vsel %vm91_vm0, %v296_v54, 0.0 }
  0xc4   :  { %301 = vadd.xlane.f32.xlu0 %v300_v55 }
 0x12f   :  { %v299_v56 = vpop.xlane.xlu0 %298 }
 0x130   :  { %v307_v60 = vperm.slane %v299_v56, %v677_v58 }
 0x137   :  { %v302_v59 = vpop.xlane.xlu0 %301 }
 0x138   :  { %v308_v61 = vperm.slane %v302_v59, %v677_v58 }
 0x13a   :  { %v310_v62 = vsel %vm309_vm1, %v308_v61, %v307_v60 }
 0x13b   :  { %v313_v63 = vsel %vm312_vm2, %v310_v62, -inf }
 0x13c   :  { %314 = vmax.xlane.f32.xlu1 %v313_v63 }
 0x1af   :  { %v315_v1 = vpop.xlane.xlu1 %314 }
 0x1b0   :  { %v317_v2 = vperm.slane %v315_v1, 0  ;;  %v318_v3 = vperm.slane %v315_v1, 1 }
 0x1b2   :  { %v321_v4 = vsub.f32 %v299_v56, %v317_v2  ;;  %v322_v5 = vsub.f32 %v302_v59, %v318_v3 }
 0x1b4   :  { %v323_v6 = vmul.f32 1.442695, %v321_v4  ;;  %v325_v7 = vmul.f32 1.442695, %v322_v5 }
 0x1b6   :  { %455 = vpow2.f32 %v323_v6 }
 0x1b7   :  { %457 = vpow2.f32 %v325_v7 }
 0x1bc   :  { %v456_v8 = vpop.eup %455 }
 0x1bd   :  { %v458_v9 = vpop.eup %457  ;;  %330 = vperm.xlu1 %447, %v456_v8  }
 0x1be   :  { %333 = vperm.xlu2 %448, %v458_v9  }
 0x218   :  { %v334_v10 = vpop.permute.xlu2 %333 }
 0x219   :  { %v336_v12 = vperm.slane %v334_v10, %v677_v58 }
 0x22f   :  { %v331_v11 = vpop.permute.xlu1 %330 }
 0x230   :  { %v335_v13 = vperm.slane %v331_v11, %v677_v58 }
 0x232   :  { %v337_v14 = vsel %vm309_vm1, %v336_v12, %v335_v13 }
 0x233   :  { %v339_v15 = vsel %vm312_vm2, %v337_v14, 0.0 }
 0x234   :  { %340 = vadd.xlane.f32.xlu2 %v339_v15 }
 0x2a7   :  { %v341_v16 = vpop.xlane.xlu2 %340 }
 0x2a8   :  { %459 = vrcp.f32 %v341_v16  ;;  %v353_v20 = vand.u32 2147483648, %v341_v16  ;;  %v351_v22 = vand.u32 2147483647, %v341_v16  ;;  %vm347_vm4 = vweird.f32 %v341_v16 }
 0x2aa   :  { %v354_v24 = vor.u32 1.1754944e-38, %v353_v20  ;;  %vm352_vm6 = vcmp.eq.f32.partialorder %v351_v22, 8.507059e+37 }
 0x2ae   :  { %v460_v17 = vpop.eup %459 }
 0x2af   :  { %v343_v18 = vmul.f32 %v460_v17, %v341_v16  ;;  %vm348_vm3 = vweird.f32 %v460_v17 }
 0x2b0   :  { %vm349_vm5 = vmor %vm347_vm4, %vm348_vm3 }
 0x2b1   :  { %v344_v19 = vsub.f32 1.0, %v343_v18 }
 0x2b3   :  { %v345_v21 = vmul.f32 %v460_v17, %v344_v19 }
 0x2b5   :  { %v346_v23 = vadd.f32 %v460_v17, %v345_v21 }
 0x2b7   :  { %v350_v25 = vsel %vm349_vm5, %v460_v17, %v346_v23 }
 0x2b8   :  { %v355_v26 = vsel %vm352_vm6, %v354_v24, %v350_v25 }
 0x2b9   :  { %v359_v27 = vperm.slane %v355_v26, 1  ;;  %v358_v28 = vperm.slane %v355_v26, 0 }
 0x2bb   :  { %v363_v29 = vmul.f32 %v458_v9, %v359_v27  ;;  %v362_v30 = vmul.f32 %v456_v8, %v358_v28 }
 0x2bd   :  { %373 = vperm.xlu1 %447, %v363_v29   ;;  %368 = vperm.xlu0 %449, %v362_v30  }
 0x32f   :  { %v374_v33 = vpop.permute.xlu1 %373  ;;  %v369_v34 = vpop.permute.xlu0 %368 }
 0x330   :  { %v377_v35 = vmul.f32 %v374_v33, %v365_v31  ;;  %v399_v36 = vperm.slane %v374_v33, %v677_v58  ;;  %v376_v37 = vmul.f32 %v369_v34, %v364_v32  ;;  %v398_v38 = vperm.slane %v369_v34, %v677_v58 }
 0x332   :  { %v385_v39 = vsel %vm91_vm0, %v377_v35, 0.0  ;;  %v378_v40 = vsel %vm91_vm0, %v376_v37, 0.0  ;;  %v400_v41 = vsel %vm309_vm1, %v399_v36, %v398_v38 }
 0x333   :  { %v386_v42 = vrot.slane %v385_v39, 4  ;;  %v379_v43 = vrot.slane %v378_v40, 4  ;;  %402 = vst.msk [vmem:[#allocation11] sm:$0x3] %vm312_vm2, %v400_v41 }
 0x334   :  { %424 = dma.vmem_to_hbm [thread:$0]  %s420_s17, 32, %s422_s20, [#allocation12]  }
 0x335   :  { %v387_v44 = vadd.f32 %v386_v42, %v385_v39  ;;  %v380_v45 = vadd.f32 %v379_v43, %v378_v40 }
 0x337   :  { %v388_v46 = vrot.slane %v387_v44, 2  ;;  %v381_v47 = vrot.slane %v380_v45, 2 }
 0x339   :  { %v389_v48 = vadd.f32 %v388_v46, %v387_v44  ;;  %v382_v49 = vadd.f32 %v381_v47, %v380_v45 }
 0x33b   :  { %v390_v50 = vrot.slane %v389_v48, 1  ;;  %v383_v51 = vrot.slane %v382_v49, 1 }
 0x33d   :  { %v391_v52 = vadd.f32 %v390_v50, %v389_v48  ;;  %v384_v53 = vadd.f32 %v383_v51, %v382_v49 }
 0x33f   :  { %v394_v54 = vsel %vm309_vm1, %v391_v52, %v384_v53 }
 0x340   :  { %397 = vst.msk [vmem:[#allocation10] sm:$0x3] %vm396_vm7, %v394_v54 }
 0x341   :  { %413 = dma.vmem_to_hbm [thread:$0]  %s409_s21, 32, %s411_s24, [#allocation4]  }
 0x342   :  { %611 = dma.done.wait [#allocation4], 32  }
 0x343   :  { %612 = vsyncadd [#allocation4], 4294967264 }
 0x344   :  { %613 = dma.done.wait [#allocation12], 32  }
 0x345   :  { %614 = vsyncadd [#allocation12], 4294967264 }
 0x346   :  { %433 = vsyncpa [#allocation3], 1 }
 0x347   :  { %434 = vsyncpa [#allocation6], 1 }
 0x348   :  { %435 = vsyncpa [#allocation9], 1 }
 0x349   :  { %436 = vsyncpa [#allocation4], 1 }
 0x34a   :  { %437 = vsyncpa [#allocation12], 1 }

</bundles_post_ra>
